<compile_context>
chip_gen: v6e
topology: v6e:2x2x1
jax: 0.10.0
libtpu: 0.0.40
codegen_flags: <defaults>
</compile_context>

<pallas_src>
import functools

import jax
import jax.numpy as jnp
from jax.experimental import pallas as pl
from jax.experimental.pallas import tpu as pltpu


def _round_up(x: int, m: int) -> int:
    return ((x + m - 1) // m) * m


def dqn_mlp_kernel(x_ref, w1_ref, b1_ref, w2_ref, b2_ref, w3_ref, b3_ref, out_ref):
    """Fused 3-layer MLP for one batch tile: relu(relu(x@W1+b1)@W2+b2)@W3+b3."""
    # Cast activation to bf16 in-kernel (halves MXU passes; f32 accumulation below).
    x = x_ref[...].astype(jnp.bfloat16)

    # Layer 1: Linear(input_size, 256) + ReLU
    h1 = jnp.dot(x, w1_ref[...], preferred_element_type=jnp.float32) + b1_ref[...]
    h1 = jnp.maximum(h1, 0.0).astype(jnp.bfloat16)

    # Layer 2: Linear(256, 512) + ReLU
    h2 = jnp.dot(h1, w2_ref[...], preferred_element_type=jnp.float32) + b2_ref[...]
    h2 = jnp.maximum(h2, 0.0).astype(jnp.bfloat16)

    # Classifier: Linear(512, n_actions_padded)
    y = jnp.dot(h2, w3_ref[...], preferred_element_type=jnp.float32) + b3_ref[...]
    out_ref[...] = y.astype(out_ref.dtype)


def prepare_kernel_params(params):
    """Pad K (input) / N (actions) dims to multiples of 128 and cast weights to bf16.

    Zero-padding is mathematically a no-op for y[:, :n_actions]; padded columns of
    W3/b3 just produce extra output lanes that the wrapper slices away.
    """
    w1, b1, w2, b2, w3, b3 = params
    k, _ = w1.shape
    _, n = w3.shape
    k_pad = _round_up(k, 128)
    n_pad = _round_up(n, 128)

    w1p = jnp.pad(w1, ((0, k_pad - k), (0, 0))).astype(jnp.bfloat16)
    w2p = w2.astype(jnp.bfloat16)
    w3p = jnp.pad(w3, ((0, 0), (0, n_pad - n))).astype(jnp.bfloat16)
    b3p = jnp.pad(b3, ((0, 0), (0, n_pad - n))).astype(jnp.float32)
    return (w1p, b1.astype(jnp.float32), w2p, b2.astype(jnp.float32), w3p, b3p)


def dqn_forward(env_input, kernel_params, n_actions, *, tb_max=128):
    """Flatten NCHW input (glue), pad to aligned tiles, run the fused Pallas MLP."""
    w1, b1, w2, b2, w3, b3 = kernel_params
    B = env_input.shape[0]
    K_pad, H1 = w1.shape
    H2, N_pad = w3.shape

    x = env_input.reshape(B, -1)                       # torch.flatten(start_dim=1)
    K = x.shape[1]

    # Batch tile: 128 rows for large B (MXU-friendly), else round B up to 8 sublanes.
    TB = tb_max if B >= tb_max else max(8, _round_up(B, 8))
    B_pad = _round_up(B, TB)
    x = jnp.pad(x, ((0, B_pad - B), (0, K_pad - K)))   # no-op pads when already aligned

    grid = (pl.cdiv(B_pad, TB),)

    resident = lambda shape: pl.BlockSpec(shape, lambda i: (0, 0))  # weights stay in VMEM

    out = pl.pallas_call(
        dqn_mlp_kernel,
        out_shape=jax.ShapeDtypeStruct((B_pad, N_pad), jnp.float32),
        grid=grid,
        in_specs=[
            pl.BlockSpec((TB, K_pad), lambda i: (i, 0)),   # x: tiled over batch
            resident(w1.shape), resident(b1.shape),
            resident(w2.shape), resident(b2.shape),
            resident(w3.shape), resident(b3.shape),
        ],
        out_specs=pl.BlockSpec((TB, N_pad), lambda i: (i, 0)),
        compiler_params=pltpu.CompilerParams(
            dimension_semantics=("parallel",),
        ),
    )(x, w1, b1, w2, b2, w3, b3)

    return out[:B, :n_actions]


def init_params(key, input_size, n_actions):
    """Deterministic init matching PyTorch nn.Linear default: U(-1/sqrt(fan_in), +1/sqrt(fan_in)).

    Weights are stored transposed vs. PyTorch: (in_features, out_features).
    """
    ks = jax.random.split(key, 6)

    def linear(kw, kb, fan_in, fan_out):
        bound = 1.0 / jnp.sqrt(fan_in)
        w = jax.random.uniform(kw, (fan_in, fan_out), jnp.float32, -bound, bound)
        b = jax.random.uniform(kb, (1, fan_out), jnp.float32, -bound, bound)
        return w, b

    w1, b1 = linear(ks[0], ks[1], input_size, 256)
    w2, b2 = linear(ks[2], ks[3], 256, 512)
    w3, b3 = linear(ks[4], ks[5], 512, n_actions)
    return (w1, b1, w2, b2, w3, b3)


def reference_forward(env_input, params):
    """Plain-JAX f32 reference for verification."""
    w1, b1, w2, b2, w3, b3 = params
    x = env_input.reshape(env_input.shape[0], -1).astype(jnp.float32)
    h1 = jnp.maximum(x @ w1 + b1, 0.0)
    h2 = jnp.maximum(h1 @ w2 + b2, 0.0)
    return h2 @ w3 + b3


if __name__ == "__main__":
    key = jax.random.PRNGKey(0)
    k_in, k_params = jax.random.split(key)

    # Small shapes consistent with a DQN over a flattened observation:
    # env_input NCHW (B=2, C=4, H=16, W=16) -> input_size = 4*16*16 = 1024, n_actions = 8
    B, C, H, W = 2, 4, 16, 16
    input_size = C * H * W
    n_actions = 8

    env_input = jax.random.normal(k_in, (B, C, H, W), dtype=jnp.float32)
    params = init_params(k_params, input_size, n_actions)          # f32, PyTorch-equivalent
    kparams = prepare_kernel_params(params)                         # padded + bf16 for the kernel

    out = dqn_forward(env_input, kparams, n_actions)
    out = jax.block_until_ready(out)

    ref = reference_forward(env_input, params)
    assert out.shape == (B, n_actions), out.shape
    # bf16 matmuls (f32 accumulation) vs f32 reference: loosened tolerance per review.
    assert jnp.allclose(out, ref, atol=5e-2, rtol=5e-2), "mismatch vs reference"

    print("KERNEL_OK")
</pallas_src>

<mosaic_0001>
module attributes {stable_mosaic.version = 11 : i64} {
  func.func @dqn_mlp_kernel(%arg0: i32, %arg1: memref<8x1024xf32, #tpu.memory_space<vmem>>, %arg2: memref<1024x256xbf16, #tpu.memory_space<vmem>>, %arg3: memref<1x256xf32, #tpu.memory_space<vmem>>, %arg4: memref<256x512xbf16, #tpu.memory_space<vmem>>, %arg5: memref<1x512xf32, #tpu.memory_space<vmem>>, %arg6: memref<512x128xbf16, #tpu.memory_space<vmem>>, %arg7: memref<1x128xf32, #tpu.memory_space<vmem>>, %arg8: memref<8x128xf32, #tpu.memory_space<vmem>>) attributes {dimension_semantics = [#tpu.dimension_semantics<parallel>], iteration_bounds = array<i64: 1>, scalar_prefetch = 0 : i64, scratch_operands = 0 : i64, tpu.core_type = #tpu.core_type<tc>, window_params = [{transform_indices = @transform_0, window_bounds = array<i64: 8, 1024>}, {pipeline_mode = #tpu.pipeline_mode<synchronous>, transform_indices = @transform_1, window_bounds = array<i64: 1024, 256>}, {pipeline_mode = #tpu.pipeline_mode<synchronous>, transform_indices = @transform_2, window_bounds = array<i64: 1, 256>}, {pipeline_mode = #tpu.pipeline_mode<synchronous>, transform_indices = @transform_3, window_bounds = array<i64: 256, 512>}, {pipeline_mode = #tpu.pipeline_mode<synchronous>, transform_indices = @transform_4, window_bounds = array<i64: 1, 512>}, {pipeline_mode = #tpu.pipeline_mode<synchronous>, transform_indices = @transform_5, window_bounds = array<i64: 512, 128>}, {pipeline_mode = #tpu.pipeline_mode<synchronous>, transform_indices = @transform_6, window_bounds = array<i64: 1, 128>}, {transform_indices = @transform_7, window_bounds = array<i64: 8, 128>}]} {
    %c0 = arith.constant 0 : index
    %c0_0 = arith.constant 0 : index
    %0 = vector.load %arg1[%c0, %c0_0] : memref<8x1024xf32, #tpu.memory_space<vmem>>, vector<8x1024xf32>
    %1 = arith.truncf %0 : vector<8x1024xf32> to vector<8x1024xbf16>
    %c0_1 = arith.constant 0 : index
    %c0_2 = arith.constant 0 : index
    %2 = vector.load %arg2[%c0_1, %c0_2] : memref<1024x256xbf16, #tpu.memory_space<vmem>>, vector<1024x256xbf16>
    %cst = arith.constant dense<0.000000e+00> : vector<8x256xf32>
    %3 = tpu.matmul %1, %2, %cst {dimension_numbers = #tpu.dot_dimension_numbers<[1], [0], [0], [1], [0, 0, 1, 1], [], []>} : vector<8x1024xbf16>, vector<1024x256xbf16>, vector<8x256xf32> -> vector<8x256xf32>
    %c0_3 = arith.constant 0 : index
    %c0_4 = arith.constant 0 : index
    %4 = vector.load %arg3[%c0_3, %c0_4] : memref<1x256xf32, #tpu.memory_space<vmem>>, vector<1x256xf32>
    %5 = vector.broadcast %4 : vector<1x256xf32> to vector<8x256xf32>
    %6 = arith.addf %3, %5 : vector<8x256xf32>
    %cst_5 = arith.constant 0.000000e+00 : f32
    %7 = vector.broadcast %cst_5 : f32 to vector<8x256xf32>
    %8 = arith.maximumf %6, %7 : vector<8x256xf32>
    %9 = arith.truncf %8 : vector<8x256xf32> to vector<8x256xbf16>
    %c0_6 = arith.constant 0 : index
    %c0_7 = arith.constant 0 : index
    %10 = vector.load %arg4[%c0_6, %c0_7] : memref<256x512xbf16, #tpu.memory_space<vmem>>, vector<256x512xbf16>
    %cst_8 = arith.constant dense<0.000000e+00> : vector<8x512xf32>
    %11 = tpu.matmul %9, %10, %cst_8 {dimension_numbers = #tpu.dot_dimension_numbers<[1], [0], [0], [1], [0, 0, 1, 1], [], []>} : vector<8x256xbf16>, vector<256x512xbf16>, vector<8x512xf32> -> vector<8x512xf32>
    %c0_9 = arith.constant 0 : index
    %c0_10 = arith.constant 0 : index
    %12 = vector.load %arg5[%c0_9, %c0_10] : memref<1x512xf32, #tpu.memory_space<vmem>>, vector<1x512xf32>
    %13 = vector.broadcast %12 : vector<1x512xf32> to vector<8x512xf32>
    %14 = arith.addf %11, %13 : vector<8x512xf32>
    %cst_11 = arith.constant 0.000000e+00 : f32
    %15 = vector.broadcast %cst_11 : f32 to vector<8x512xf32>
    %16 = arith.maximumf %14, %15 : vector<8x512xf32>
    %17 = arith.truncf %16 : vector<8x512xf32> to vector<8x512xbf16>
    %c0_12 = arith.constant 0 : index
    %c0_13 = arith.constant 0 : index
    %18 = vector.load %arg6[%c0_12, %c0_13] : memref<512x128xbf16, #tpu.memory_space<vmem>>, vector<512x128xbf16>
    %cst_14 = arith.constant dense<0.000000e+00> : vector<8x128xf32>
    %19 = tpu.matmul %17, %18, %cst_14 {dimension_numbers = #tpu.dot_dimension_numbers<[1], [0], [0], [1], [0, 0, 1, 1], [], []>} : vector<8x512xbf16>, vector<512x128xbf16>, vector<8x128xf32> -> vector<8x128xf32>
    %c0_15 = arith.constant 0 : index
    %c0_16 = arith.constant 0 : index
    %20 = vector.load %arg7[%c0_15, %c0_16] : memref<1x128xf32, #tpu.memory_space<vmem>>, vector<1x128xf32>
    %21 = vector.broadcast %20 : vector<1x128xf32> to vector<8x128xf32>
    %22 = arith.addf %19, %21 : vector<8x128xf32>
    %c0_17 = arith.constant 0 : index
    %c0_18 = arith.constant 0 : index
    %23 = vector.load %arg8[%c0_17, %c0_18] : memref<8x128xf32, #tpu.memory_space<vmem>>, vector<8x128xf32>
    tpu.vector_store %arg8[%c0_17, %c0_18], %22 {strides = array<i32>} : memref<8x128xf32, #tpu.memory_space<vmem>>, vector<8x128xf32>,
    return
  }
  func.func @transform_0(%arg0: i32) -> (i32, i32) {
    %c0_i32 = arith.constant 0 : i32
    %c0_i32_0 = arith.constant 0 : i32
    return %arg0, %c0_i32 : i32, i32
  }
  func.func @transform_1(%arg0: i32) -> (i32, i32) {
    %c0_i32 = arith.constant 0 : i32
    %c0_i32_0 = arith.constant 0 : i32
    %c0_i32_1 = arith.constant 0 : i32
    return %c0_i32, %c0_i32_0 : i32, i32
  }
  func.func @transform_2(%arg0: i32) -> (i32, i32) {
    %c0_i32 = arith.constant 0 : i32
    %c0_i32_0 = arith.constant 0 : i32
    %c0_i32_1 = arith.constant 0 : i32
    return %c0_i32, %c0_i32_0 : i32, i32
  }
  func.func @transform_3(%arg0: i32) -> (i32, i32) {
    %c0_i32 = arith.constant 0 : i32
    %c0_i32_0 = arith.constant 0 : i32
    %c0_i32_1 = arith.constant 0 : i32
    return %c0_i32, %c0_i32_0 : i32, i32
  }
  func.func @transform_4(%arg0: i32) -> (i32, i32) {
    %c0_i32 = arith.constant 0 : i32
    %c0_i32_0 = arith.constant 0 : i32
    %c0_i32_1 = arith.constant 0 : i32
    return %c0_i32, %c0_i32_0 : i32, i32
  }
  func.func @transform_5(%arg0: i32) -> (i32, i32) {
    %c0_i32 = arith.constant 0 : i32
    %c0_i32_0 = arith.constant 0 : i32
    %c0_i32_1 = arith.constant 0 : i32
    return %c0_i32, %c0_i32_0 : i32, i32
  }
  func.func @transform_6(%arg0: i32) -> (i32, i32) {
    %c0_i32 = arith.constant 0 : i32
    %c0_i32_0 = arith.constant 0 : i32
    %c0_i32_1 = arith.constant 0 : i32
    return %c0_i32, %c0_i32_0 : i32, i32
  }
  func.func @transform_7(%arg0: i32) -> (i32, i32) {
    %c0_i32 = arith.constant 0 : i32
    %c0_i32_0 = arith.constant 0 : i32
    return %arg0, %c0_i32 : i32, i32
  }
}

</mosaic_0001>

<bundles_post_ra>
// kernel: tpu_custom_call.1
= control target key start
LH: loop header
LB: loop body
LE: loop exit
PB: predicated region body
PF: predicated region fallthrough
CT: control target
= control target key end

     0   :  { %12 = vsyncpa [#allocation3], 0  ;;  %s2699_s0 = inlined_call_operand.hbm [shape: f32[8,1024], index: 0, kind: input, shape index: {}]   ;;  %s2700_s1 = inlined_call_operand.hbm [shape: bf16[1024,256], index: 1, kind: input, shape index: {}]   ;;  %s2701_s2 = inlined_call_operand.vmem [shape: f32[1,256], index: 2, kind: input, shape index: {}]   ;;  %s2702_s3 = inlined_call_operand.hbm [shape: bf16[256,512], index: 3, kind: input, shape index: {}]   ;;  %s2703_s4 = inlined_call_operand.vmem [shape: f32[1,512], index: 4, kind: input, shape index: {}]   ;;  %s2704_s5 = inlined_call_operand.hbm [shape: bf16[512,128], index: 5, kind: input, shape index: {}]   ;;  %s2705_s6 = inlined_call_operand.vmem [shape: f32[1,128], index: 6, kind: input, shape index: {}]   ;;  %s2706_s7 = inlined_call_operand.hbm [shape: f32[8,128], index: 7, kind: output, shape index: {}]  }
   0x1   :  { %13 = vsyncpa [#allocation6], 0 }
   0x2   :  { %14 = vsyncpa [#allocation9], 0 }
   0x3   :  { %15 = vsyncpa [#allocation4], 0  ;;  %s2610_s24 = smov [#allocation5]  }
   0x4   :  { %s31_s25 = sshll.u32 %s2610_s24, 4  ;;  %s32_s25 = int_to_ptr.vmem [resolvable:$true] %s31_s25 }
   0x5   :  { %s2510_s26 = scalar_lea.vmem %s32_s25, 16384  ;;  %p2515_p1 = scmp.lt.s32.totalorder %s32_s25, %s32_s25 }
   0x6   :  { %p2511_p0 = scmp.ne.s32.totalorder %s32_s25, %s2510_s26  ;;  %p2516_p2 = scmp.lt.s32.totalorder %s2510_s26, %s2510_s26 }
   0x8   :  { %p2517_p3 = por %p2516_p2, %p2515_p1 }
   0xa   :  { %p2518_p4 = pnand %p2517_p3, %p2511_p0 }
   0xc   :  { %2521 = shalt.err (!%p2518_p4)
}
   0xd   :  { %s2611_s27 = smov 128   ;;  %s2612_s28 = smov 8  }
   0xe   :  { %37 = dma.hbm_to_vmem [thread:$0]  %s2700_s1, 16384, %s32_s25, [#allocation6], %s2611_s27, %s2611_s27, %s2612_s28  }
   0xf   :  { %s2613_s8 = smov [#allocation2]   ;;  %s2614_s10 = smov [#allocation7]  }
  0x10   :  { %s22_s9 = sshll.u32 %s2613_s8, 4  ;;  %s45_s11 = sshll.u32 %s2614_s10, 4  ;;  %s23_s9 = int_to_ptr.vmem [resolvable:$true] %s22_s9  ;;  %s46_s11 = int_to_ptr.vmem [resolvable:$true] %s45_s11 }
  0x11   :  { %s2530_s12 = scalar_lea.vmem %s23_s9, 1024  ;;  %p2535_p6 = scmp.lt.s32.totalorder %s23_s9, %s23_s9 }
  0x12   :  { %p2531_p5 = scmp.ne.s32.totalorder %s23_s9, %s2530_s12  ;;  %p2536_p7 = scmp.lt.s32.totalorder %s2530_s12, %s2530_s12 }
  0x14   :  { %p2537_p8 = por %p2536_p7, %p2535_p6 }
  0x16   :  { %p2538_p9 = pnand %p2537_p8, %p2531_p5 }
  0x18   :  { %2541 = shalt.err (!%p2538_p9)
}
  0x19   :  { %25 = dma.hbm_to_vmem [thread:$0]  %s2699_s0, 1024, %s23_s9, [#allocation3]  }
  0x1a   :  { %s2550_s15 = scalar_lea.vmem %s46_s11, 8192  ;;  %p2555_p11 = scmp.lt.s32.totalorder %s46_s11, %s46_s11 }
  0x1b   :  { %p2551_p10 = scmp.ne.s32.totalorder %s46_s11, %s2550_s15  ;;  %p2556_p12 = scmp.lt.s32.totalorder %s2550_s15, %s2550_s15 }
  0x1d   :  { %p2557_p13 = por %p2556_p12, %p2555_p11 }
  0x1f   :  { %p2558_p0 = pnand %p2557_p13, %p2551_p10 }
  0x21   :  { %2561 = shalt.err (!%p2558_p0)
}
  0x22   :  { %s2615_s1 = smov 256   ;;  %s2616_s16 = smov 16  }
  0x23   :  { %51 = dma.hbm_to_vmem [thread:$0]  %s2702_s3, 8192, %s46_s11, [#allocation6], %s2615_s1, %s2615_s1, %s2616_s16  }
  0x24   :  { %s2617_s19 = smov [#allocation8]  }
  0x25   :  { %s59_s20 = sshll.u32 %s2617_s19, 4  ;;  %s60_s20 = int_to_ptr.vmem [resolvable:$true] %s59_s20 }
  0x26   :  { %s2570_s21 = scalar_lea.vmem %s60_s20, 4096  ;;  %p2575_p2 = scmp.lt.s32.totalorder %s60_s20, %s60_s20 }
  0x27   :  { %p2571_p1 = scmp.ne.s32.totalorder %s60_s20, %s2570_s21  ;;  %p2576_p3 = scmp.lt.s32.totalorder %s2570_s21, %s2570_s21 }
  0x29   :  { %p2577_p4 = por %p2576_p3, %p2575_p2 }
  0x2b   :  { %p2578_p5 = pnand %p2577_p4, %p2571_p1 }
  0x2d   :  { %2581 = shalt.err (!%p2578_p5)
}
  0x2e   :  { %s2618_s0 = smov 64   ;;  %s2619_s22 = smov 4  }
  0x2f   :  { %65 = dma.hbm_to_vmem [thread:$0]  %s2704_s5, 4096, %s60_s20, [#allocation9], %s2618_s0, %s2618_s0, %s2619_s22  }
  0x30   :  { %2602 = dma.done.wait [#allocation3], 1024  }
  0x31   :  { %2603 = vsyncadd [#allocation3], 4294966272 }
  0x32   :  { %2604 = dma.done.wait [#allocation6], 24576  }
  0x33   :  { %2605 = vsyncadd [#allocation6], 4294942720 }
  0x34   :  { %2606 = dma.done.wait [#allocation9], 4096  }
  0x35   :  { %2607 = vsyncadd [#allocation9], 4294963200  ;;  %v2182_v0 = vld [vmem:[#allocation5 + $0x74] ss:$8 sps:$4 sm:$0xff]   ;;  %v2186_v2 = vld [vmem:[#allocation5 + $0x70] ss:$8 sps:$4 sm:$0xff]  }
  0x36   :  { %v2184_v1 = vld [vmem:[#allocation5 + $0x174] ss:$8 sps:$4 sm:$0xff]   ;;  %877 = vmatprep.subr.bf16.mxu0 %v2182_v0  ;;  %v2187_v3 = vld [vmem:[#allocation5 + $0x170] ss:$8 sps:$4 sm:$0xff]   ;;  %v2188_v4 = vld [vmem:[#allocation5 + $0x64] ss:$8 sps:$4 sm:$0xff]  }
  0x37   :  { %918 = vmatprep.subr.bf16.mxu1 %v2184_v1  ;;  %878 = vmatpush1.bf16.msra.mxu0 %v2186_v2  ;;  %v2190_v5 = vld [vmem:[#allocation5 + $0x164] ss:$8 sps:$4 sm:$0xff]   ;;  %v2192_v6 = vld [vmem:[#allocation5 + $0x60] ss:$8 sps:$4 sm:$0xff]   ;;  %v2194_v8 = vld [vmem:[#allocation5 + $0x54] ss:$8 sps:$4 sm:$0xff]  }
  0x38   :  { %919 = vmatpush1.bf16.msra.mxu1 %v2187_v3  ;;  %879 = vmatprep.subr.bf16.mxu0 %v2188_v4  ;;  %v2193_v7 = vld [vmem:[#allocation5 + $0x160] ss:$8 sps:$4 sm:$0xff]   ;;  %v2196_v9 = vld [vmem:[#allocation5 + $0x154] ss:$8 sps:$4 sm:$0xff]   ;;  %v2198_v10 = vld [vmem:[#allocation5 + $0x50] ss:$8 sps:$4 sm:$0xff]  }
  0x39   :  { %920 = vmatprep.subr.bf16.mxu1 %v2190_v5  ;;  %v2199_v11 = vld [vmem:[#allocation5 + $0x150] ss:$8 sps:$4 sm:$0xff]   ;;  %v2200_v12 = vld [vmem:[#allocation5 + $0x44] ss:$8 sps:$4 sm:$0xff]   ;;  %v2204_v14 = vld [vmem:[#allocation5 + $0x40] ss:$8 sps:$4 sm:$0xff]  }
  0x3a   :  { %v2202_v13 = vld [vmem:[#allocation5 + $0x144] ss:$8 sps:$4 sm:$0xff]   ;;  %v2205_v15 = vld [vmem:[#allocation5 + $0x140] ss:$8 sps:$4 sm:$0xff]   ;;  %v2206_v16 = vld [vmem:[#allocation5 + $0x34] ss:$8 sps:$4 sm:$0xff]  }
  0x3b   :  { %880 = vmatpush1.bf16.msra.mxu0 %v2192_v6  ;;  %v2208_v17 = vld [vmem:[#allocation5 + $0x134] ss:$8 sps:$4 sm:$0xff]   ;;  %v2210_v18 = vld [vmem:[#allocation5 + $0x30] ss:$8 sps:$4 sm:$0xff]   ;;  %v2212_v20 = vld [vmem:[#allocation5 + $0x24] ss:$8 sps:$4 sm:$0xff]  }
  0x3c   :  { %921 = vmatpush1.bf16.msra.mxu1 %v2193_v7  ;;  %881 = vmatprep.subr.bf16.mxu0 %v2194_v8  ;;  %v2211_v19 = vld [vmem:[#allocation5 + $0x130] ss:$8 sps:$4 sm:$0xff]   ;;  %v2214_v21 = vld [vmem:[#allocation5 + $0x124] ss:$8 sps:$4 sm:$0xff]   ;;  %v2216_v22 = vld [vmem:[#allocation5 + $0x20] ss:$8 sps:$4 sm:$0xff]  }
  0x3d   :  { %922 = vmatprep.subr.bf16.mxu1 %v2196_v9  ;;  %v2217_v23 = vld [vmem:[#allocation5 + $0x120] ss:$8 sps:$4 sm:$0xff]   ;;  %v2218_v24 = vld [vmem:[#allocation5 + $0x14] ss:$8 sps:$4 sm:$0xff]   ;;  %v2222_v26 = vld [vmem:[#allocation5 + $0x10] ss:$8 sps:$4 sm:$0xff]  }
  0x3e   :  { %v2220_v25 = vld [vmem:[#allocation5 + $0x114] ss:$8 sps:$4 sm:$0xff]   ;;  %v2223_v27 = vld [vmem:[#allocation5 + $0x110] ss:$8 sps:$4 sm:$0xff]   ;;  %v2224_v28 = vld [vmem:[#allocation5 + $0x4] ss:$8 sps:$4 sm:$0xff]  }
  0x3f   :  { %882 = vmatpush1.bf16.msra.mxu0 %v2198_v10  ;;  %v2226_v29 = vld [vmem:[#allocation5 + $0x104] ss:$8 sps:$4 sm:$0xff]   ;;  %v2228_v30 = vld [vmem:[#allocation5] ss:$8 sps:$4 sm:$0xff]   ;;  %v2230_v32 = vld [vmem:[#allocation5 + $0xf4] ss:$8 sps:$4 sm:$0xff]  }
  0x40   :  { %923 = vmatpush1.bf16.msra.mxu1 %v2199_v11  ;;  %883 = vmatprep.subr.bf16.mxu0 %v2200_v12  ;;  %v2229_v31 = vld [vmem:[#allocation5 + $0x100] ss:$8 sps:$4 sm:$0xff]   ;;  %v2232_v33 = vld [vmem:[#allocation5 + $0x1f4] ss:$8 sps:$4 sm:$0xff]   ;;  %v2234_v34 = vld [vmem:[#allocation5 + $0xf0] ss:$8 sps:$4 sm:$0xff]  }
  0x41   :  { %924 = vmatprep.subr.bf16.mxu1 %v2202_v13  ;;  %v2235_v35 = vld [vmem:[#allocation5 + $0x1f0] ss:$8 sps:$4 sm:$0xff]   ;;  %v2236_v36 = vld [vmem:[#allocation5 + $0xe4] ss:$8 sps:$4 sm:$0xff]   ;;  %v2240_v38 = vld [vmem:[#allocation5 + $0xe0] ss:$8 sps:$4 sm:$0xff]  }
  0x42   :  { %v2238_v37 = vld [vmem:[#allocation5 + $0x1e4] ss:$8 sps:$4 sm:$0xff]   ;;  %v2241_v39 = vld [vmem:[#allocation5 + $0x1e0] ss:$8 sps:$4 sm:$0xff]   ;;  %v2242_v40 = vld [vmem:[#allocation5 + $0xd4] ss:$8 sps:$4 sm:$0xff]  }
  0x43   :  { %884 = vmatpush1.bf16.msra.mxu0 %v2204_v14  ;;  %v2244_v41 = vld [vmem:[#allocation5 + $0x1d4] ss:$8 sps:$4 sm:$0xff]   ;;  %v2246_v42 = vld [vmem:[#allocation5 + $0xd0] ss:$8 sps:$4 sm:$0xff]   ;;  %v2248_v44 = vld [vmem:[#allocation5 + $0xc4] ss:$8 sps:$4 sm:$0xff]  }
  0x44   :  { %925 = vmatpush1.bf16.msra.mxu1 %v2205_v15  ;;  %885 = vmatprep.subr.bf16.mxu0 %v2206_v16  ;;  %v2247_v43 = vld [vmem:[#allocation5 + $0x1d0] ss:$8 sps:$4 sm:$0xff]   ;;  %v2250_v45 = vld [vmem:[#allocation5 + $0x1c4] ss:$8 sps:$4 sm:$0xff]   ;;  %v2252_v47 = vld [vmem:[#allocation5 + $0xc0] ss:$8 sps:$4 sm:$0xff]  }
  0x45   :  { %926 = vmatprep.subr.bf16.mxu1 %v2208_v17  ;;  %v82_v46 = vld [vmem:[#allocation2 + $0x8] sm:$0xff]  ;;  %v84_v50 = vld [vmem:[#allocation2 + $0x18] sm:$0xff]  ;;  %v81_v4 = vld [vmem:[#allocation2] sm:$0xff]  ;;  %s2620_s27 = smov [#allocation10]  }
  0x46   :  { %v2253_v48 = vld [vmem:[#allocation5 + $0x1c0] ss:$8 sps:$4 sm:$0xff]   ;;  %v90_v49 = vpack.c.bf16 %v82_v46, %v82_v46  ;;  %v2254_v51 = vld [vmem:[#allocation5 + $0xb4] ss:$8 sps:$4 sm:$0xff]   ;;  %v92_v52 = vpack.c.bf16 %v84_v50, %v84_v50  ;;  %v2258_v54 = vld [vmem:[#allocation5 + $0xb0] ss:$8 sps:$4 sm:$0xff]   ;;  %v89_v8 = vpack.c.bf16 %v81_v4, %v81_v4 }
  0x47   :  { %886 = vmatpush1.bf16.msra.mxu0 %v2210_v18  ;;  %v2256_v53 = vld [vmem:[#allocation5 + $0x1b4] ss:$8 sps:$4 sm:$0xff]   ;;  %v2259_v55 = vld [vmem:[#allocation5 + $0x1b0] ss:$8 sps:$4 sm:$0xff]   ;;  %v2260_v56 = vld [vmem:[#allocation5 + $0xa4] ss:$8 sps:$4 sm:$0xff]  }
  0x48   :  { %927 = vmatpush1.bf16.msra.mxu1 %v2211_v19  ;;  %887 = vmatprep.subr.bf16.mxu0 %v2212_v20  ;;  %v2262_v57 = vld [vmem:[#allocation5 + $0x1a4] ss:$8 sps:$4 sm:$0xff]   ;;  %v2264_v58 = vld [vmem:[#allocation5 + $0xa0] ss:$8 sps:$4 sm:$0xff]   ;;  %v2266_v60 = vld [vmem:[#allocation5 + $0x94] ss:$8 sps:$4 sm:$0xff]  }
  0x49   :  { %928 = vmatprep.subr.bf16.mxu1 %v2214_v21  ;;  %909 = vmatprep.mubr.bf16.mxu0 %v90_v49  ;;  %v2265_v59 = vld [vmem:[#allocation5 + $0x1a0] ss:$8 sps:$4 sm:$0xff]   ;;  %v2268_v61 = vld [vmem:[#allocation5 + $0x194] ss:$8 sps:$4 sm:$0xff]   ;;  %v2270_v62 = vld [vmem:[#allocation5 + $0x90] ss:$8 sps:$4 sm:$0xff]  }
  0x4a   :  { %950 = vmatprep.mubr.bf16.mxu1 %v92_v52  ;;  %v2271_v63 = vld [vmem:[#allocation5 + $0x190] ss:$8 sps:$4 sm:$0xff]   ;;  %v2272_v0 = vld [vmem:[#allocation5 + $0x84] ss:$8 sps:$4 sm:$0xff]   ;;  %v2276_v2 = vld [vmem:[#allocation5 + $0x80] ss:$8 sps:$4 sm:$0xff]  }
  0x4b   :  { %888 = vmatpush1.bf16.msra.mxu0 %v2216_v22  ;;  %v2274_v1 = vld [vmem:[#allocation5 + $0x184] ss:$8 sps:$4 sm:$0xff]   ;;  %v2277_v3 = vld [vmem:[#allocation5 + $0x180] ss:$8 sps:$4 sm:$0xff]   ;;  %v83_v5 = vld [vmem:[#allocation2 + $0x10] sm:$0xff]  ;;  %s1891_s28 = sshll.u32 %s2620_s27, 4  ;;  %s1892_s28 = int_to_ptr.vmem [resolvable:$true] %s1891_s28 }
  0x4c   :  { %929 = vmatpush1.bf16.msra.mxu1 %v2217_v23  ;;  %889 = vmatprep.subr.bf16.mxu0 %v2218_v24  ;;  %v2280_v6 = vld [vmem:[#allocation5 + $0x274] ss:$8 sps:$4 sm:$0xff]   ;;  %v91_v9 = vpack.c.bf16 %v83_v5, %v83_v5  ;;  %v2278_v10 = vld [vmem:[#allocation5 + $0x270] ss:$8 sps:$4 sm:$0xff]   ;;  %v2286_v12 = vld [vmem:[#allocation5 + $0x264] ss:$8 sps:$4 sm:$0xff]   ;;  %p2587_p7 = scmp.lt.s32.totalorder %s1892_s28, %s1892_s28 }
  0x4d   :  { %930 = vmatprep.subr.bf16.mxu1 %v2220_v25  ;;  %v2283_v7 = vld [vmem:[#allocation5 + $0x374] ss:$8 sps:$4 sm:$0xff]   ;;  %v2281_v11 = vld [vmem:[#allocation5 + $0x370] ss:$8 sps:$4 sm:$0xff]   ;;  %v2289_v13 = vld [vmem:[#allocation5 + $0x364] ss:$8 sps:$4 sm:$0xff]  }
  0x4e   :  { %v2284_v14 = vld [vmem:[#allocation5 + $0x260] ss:$8 sps:$4 sm:$0xff]   ;;  %v2292_v16 = vld [vmem:[#allocation5 + $0x254] ss:$8 sps:$4 sm:$0xff]   ;;  %v2290_v18 = vld [vmem:[#allocation5 + $0x250] ss:$8 sps:$4 sm:$0xff]  }
  0x4f   :  { %890 = vmatpush1.bf16.msra.mxu0 %v2222_v26  ;;  %v2287_v15 = vld [vmem:[#allocation5 + $0x360] ss:$8 sps:$4 sm:$0xff]   ;;  %v2295_v17 = vld [vmem:[#allocation5 + $0x354] ss:$8 sps:$4 sm:$0xff]   ;;  %v2293_v19 = vld [vmem:[#allocation5 + $0x350] ss:$8 sps:$4 sm:$0xff]  }
  0x50   :  { %931 = vmatpush1.bf16.msra.mxu1 %v2223_v27  ;;  %891 = vmatprep.subr.bf16.mxu0 %v2224_v28  ;;  %v2298_v20 = vld [vmem:[#allocation5 + $0x244] ss:$8 sps:$4 sm:$0xff]   ;;  %v2296_v22 = vld [vmem:[#allocation5 + $0x240] ss:$8 sps:$4 sm:$0xff]   ;;  %v2304_v24 = vld [vmem:[#allocation5 + $0x234] ss:$8 sps:$4 sm:$0xff]  }
  0x51   :  { %932 = vmatprep.subr.bf16.mxu1 %v2226_v29  ;;  %v2301_v21 = vld [vmem:[#allocation5 + $0x344] ss:$8 sps:$4 sm:$0xff]   ;;  %v2299_v23 = vld [vmem:[#allocation5 + $0x340] ss:$8 sps:$4 sm:$0xff]   ;;  %v2307_v25 = vld [vmem:[#allocation5 + $0x334] ss:$8 sps:$4 sm:$0xff]  }
  0x52   :  { %v2302_v26 = vld [vmem:[#allocation5 + $0x230] ss:$8 sps:$4 sm:$0xff]   ;;  %v2310_v28 = vld [vmem:[#allocation5 + $0x224] ss:$8 sps:$4 sm:$0xff]   ;;  %v2332_v50 = vld [vmem:[#allocation5 + $0x2e0] ss:$8 sps:$4 sm:$0xff]  }
  0x53   :  { %892 = vmatpush1.bf16.msra.mxu0 %v2228_v30  ;;  %v2305_v27 = vld [vmem:[#allocation5 + $0x330] ss:$8 sps:$4 sm:$0xff]   ;;  %v2313_v29 = vld [vmem:[#allocation5 + $0x324] ss:$8 sps:$4 sm:$0xff]   ;;  %v2308_v30 = vld [vmem:[#allocation5 + $0x220] ss:$8 sps:$4 sm:$0xff]  }
  0x54   :  { %933 = vmatpush1.bf16.msra.mxu1 %v2229_v31  ;;  %893 = vmatprep.subr.bf16.mxu0 %v2230_v32  ;;  %v2311_v31 = vld [vmem:[#allocation5 + $0x320] ss:$8 sps:$4 sm:$0xff]   ;;  %v2316_v32 = vld [vmem:[#allocation5 + $0x214] ss:$8 sps:$4 sm:$0xff]   ;;  %v2326_v46 = vld [vmem:[#allocation5 + $0x2f0] ss:$8 sps:$4 sm:$0xff]  }
  0x55   :  { %934 = vmatprep.subr.bf16.mxu1 %v2232_v33  ;;  %v2319_v33 = vld [vmem:[#allocation5 + $0x314] ss:$8 sps:$4 sm:$0xff]   ;;  %v2337_v49 = vld [vmem:[#allocation5 + $0x3e4] ss:$8 sps:$4 sm:$0xff]   ;;  %s2582_s29 = scalar_lea.vmem %s1892_s28, 128 }
  0x56   :  { %v2340_v52 = vld [vmem:[#allocation5 + $0x2d4] ss:$8 sps:$4 sm:$0xff]   ;;  %p2583_p6 = scmp.ne.s32.totalorder %s1892_s28, %s2582_s29  ;;  %p2588_p8 = scmp.lt.s32.totalorder %s2582_s29, %s2582_s29 }
  0x57   :  { %894 = vmatpush2.bf16.msra.mxu0 %v2234_v34  ;;  %v2314_v34 = vld [vmem:[#allocation5 + $0x210] ss:$8 sps:$4 sm:$0xff]   ;;  %v2364_v4 = vld [vmem:[#allocation5 + $0x294] ss:$8 sps:$4 sm:$0xff]  }
  0x58   :  { %935 = vmatpush2.bf16.msra.mxu1 %v2235_v35  ;;  %895 = vmatprep.subr.bf16.mxu0 %v2236_v36  ;;  %v86_v35 = vld [vmem:[#allocation2 + $0x28] sm:$0xff]  ;;  %v2317_v36 = vld [vmem:[#allocation5 + $0x310] ss:$8 sps:$4 sm:$0xff]   ;;  %v2367_v5 = vld [vmem:[#allocation5 + $0x394] ss:$8 sps:$4 sm:$0xff]   ;;  %p2589_p9 = por %p2588_p8, %p2587_p7 }
  0x59   :  { %936 = vmatprep.subr.bf16.mxu1 %v2238_v37  ;;  %v2322_v37 = vld [vmem:[#allocation5 + $0x204] ss:$8 sps:$4 sm:$0xff]  }
  0x5a   :  { %p2590_p10 = pnand %p2589_p9, %p2583_p6 }
  0x5b   :  { %896 = vmatpush2.bf16.msra.mxu0 %v2240_v38  ;;  %v94_v38 = vpack.c.bf16 %v86_v35, %v86_v35  ;;  %v2401_v35 = vld [vmem:[#allocation7 + $0x68] ss:$16 sps:$4 sm:$0xff]  }
  0x5c   :  { %937 = vmatpush2.bf16.msra.mxu1 %v2241_v39  ;;  %897 = vmatprep.subr.bf16.mxu0 %v2242_v40  ;;  %v88_v39 = vld [vmem:[#allocation2 + $0x38] sm:$0xff]  ;;  %v2325_v40 = vld [vmem:[#allocation5 + $0x304] ss:$8 sps:$4 sm:$0xff]  }
  0x5d   :  { %938 = vmatprep.subr.bf16.mxu1 %v2244_v41  ;;  %v96_v41 = vpack.c.bf16 %v88_v39, %v88_v39  ;;  %v2407_v39 = vld [vmem:[#allocation7 + $0x48] ss:$16 sps:$4 sm:$0xff]  }
  0x5f   :  { %898 = vmatpush2.bf16.msra.mxu0 %v2246_v42  ;;  %v2320_v42 = vld [vmem:[#allocation5 + $0x200] ss:$8 sps:$4 sm:$0xff]  }
  0x60   :  { %939 = vmatpush2.bf16.msra.mxu1 %v2247_v43  ;;  %899 = vmatprep.subr.bf16.mxu0 %v2248_v44  ;;  %v2323_v43 = vld [vmem:[#allocation5 + $0x300] ss:$8 sps:$4 sm:$0xff]   ;;  %v2328_v44 = vld [vmem:[#allocation5 + $0x2f4] ss:$8 sps:$4 sm:$0xff]  }
  0x61   :  { %940 = vmatprep.subr.bf16.mxu1 %v2250_v45  ;;  %v2331_v45 = vld [vmem:[#allocation5 + $0x3f4] ss:$8 sps:$4 sm:$0xff]  }
  0x63   :  { %900 = vmatpush2.bf16.msra.mxu0 %v2252_v47  ;;  %v2329_v47 = vld [vmem:[#allocation5 + $0x3f0] ss:$8 sps:$4 sm:$0xff]  }
  0x64   :  { %941 = vmatpush2.bf16.msra.mxu1 %v2253_v48  ;;  %901 = vmatprep.subr.bf16.mxu0 %v2254_v51  ;;  %v2334_v48 = vld [vmem:[#allocation5 + $0x2e4] ss:$8 sps:$4 sm:$0xff]   ;;  %v2335_v51 = vld [vmem:[#allocation5 + $0x3e0] ss:$8 sps:$4 sm:$0xff]  }
  0x65   :  { %942 = vmatprep.subr.bf16.mxu1 %v2256_v53  ;;  %v2343_v53 = vld [vmem:[#allocation5 + $0x3d4] ss:$8 sps:$4 sm:$0xff]  }
  0x67   :  { %902 = vmatpush2.bf16.msra.mxu0 %v2258_v54  ;;  %v2338_v54 = vld [vmem:[#allocation5 + $0x2d0] ss:$8 sps:$4 sm:$0xff]  }
  0x68   :  { %943 = vmatpush2.bf16.msra.mxu1 %v2259_v55  ;;  %903 = vmatprep.subr.bf16.mxu0 %v2260_v56  ;;  %v2341_v55 = vld [vmem:[#allocation5 + $0x3d0] ss:$8 sps:$4 sm:$0xff]   ;;  %v2346_v56 = vld [vmem:[#allocation5 + $0x2c4] ss:$8 sps:$4 sm:$0xff]  }
  0x69   :  { %944 = vmatprep.subr.bf16.mxu1 %v2262_v57  ;;  %v2349_v57 = vld [vmem:[#allocation5 + $0x3c4] ss:$8 sps:$4 sm:$0xff]  }
  0x6b   :  { %904 = vmatpush2.bf16.msra.mxu0 %v2264_v58  ;;  %v2344_v58 = vld [vmem:[#allocation5 + $0x2c0] ss:$8 sps:$4 sm:$0xff]  }
  0x6c   :  { %945 = vmatpush2.bf16.msra.mxu1 %v2265_v59  ;;  %905 = vmatprep.subr.bf16.mxu0 %v2266_v60  ;;  %v2347_v59 = vld [vmem:[#allocation5 + $0x3c0] ss:$8 sps:$4 sm:$0xff]   ;;  %v2352_v60 = vld [vmem:[#allocation5 + $0x2b4] ss:$8 sps:$4 sm:$0xff]  }
  0x6d   :  { %946 = vmatprep.subr.bf16.mxu1 %v2268_v61  ;;  %v2355_v61 = vld [vmem:[#allocation5 + $0x3b4] ss:$8 sps:$4 sm:$0xff]  }
  0x6f   :  { %906 = vmatpush2.bf16.msra.mxu0 %v2270_v62  ;;  %v2350_v62 = vld [vmem:[#allocation5 + $0x2b0] ss:$8 sps:$4 sm:$0xff]  }
  0x70   :  { %947 = vmatpush2.bf16.msra.mxu1 %v2271_v63  ;;  %907 = vmatprep.subr.bf16.mxu0 %v2272_v0  ;;  %v2353_v63 = vld [vmem:[#allocation5 + $0x3b0] ss:$8 sps:$4 sm:$0xff]   ;;  %v2358_v0 = vld [vmem:[#allocation5 + $0x2a4] ss:$8 sps:$4 sm:$0xff]  }
  0x71   :  { %948 = vmatprep.subr.bf16.mxu1 %v2274_v1  ;;  %v2361_v1 = vld [vmem:[#allocation5 + $0x3a4] ss:$8 sps:$4 sm:$0xff]  }
  0x73   :  { %908 = vmatpush2.bf16.msra.mxu0 %v2276_v2  ;;  %v2356_v2 = vld [vmem:[#allocation5 + $0x2a0] ss:$8 sps:$4 sm:$0xff]  }
  0x74   :  { %949 = vmatpush2.bf16.msra.mxu1 %v2277_v3  ;;  %959 = vmatprep.subr.bf16.mxu0 %v2280_v6  ;;  %v2359_v3 = vld [vmem:[#allocation5 + $0x3a0] ss:$8 sps:$4 sm:$0xff]   ;;  %v2362_v6 = vld [vmem:[#allocation5 + $0x290] ss:$8 sps:$4 sm:$0xff]  }
  0x75   :  { %1000 = vmatprep.subr.bf16.mxu1 %v2283_v7  ;;  %v2365_v7 = vld [vmem:[#allocation5 + $0x390] ss:$8 sps:$4 sm:$0xff]  }
  0x76   :  { %910 = vmatmul.mubr.bf16.vlgmr.msra.gmra.mxu0 %v89_v8  ;;  %v2370_v8 = vld [vmem:[#allocation5 + $0x284] ss:$8 sps:$4 sm:$0xff]  }
  0x77   :  { %951 = vmatmul.mubr.bf16.vlgmr.msra.gmra.mxu1 %v91_v9  ;;  %960 = vmatpush1.bf16.msra.mxu0 %v2278_v10  ;;  %v2373_v9 = vld [vmem:[#allocation5 + $0x384] ss:$8 sps:$4 sm:$0xff]   ;;  %v2368_v10 = vld [vmem:[#allocation5 + $0x280] ss:$8 sps:$4 sm:$0xff]  }
  0x78   :  { %1001 = vmatpush1.bf16.msra.mxu1 %v2281_v11  ;;  %961 = vmatprep.subr.bf16.mxu0 %v2286_v12  ;;  %v2371_v11 = vld [vmem:[#allocation5 + $0x380] ss:$8 sps:$4 sm:$0xff]  }
  0x79   :  { %1002 = vmatprep.subr.bf16.mxu1 %v2289_v13  ;;  %991 = vmatprep.mubr.bf16.mxu0 %v94_v38  ;;  %v85_v12 = vld [vmem:[#allocation2 + $0x20] sm:$0xff]  ;;  %v87_v13 = vld [vmem:[#allocation2 + $0x30] sm:$0xff] }
  0x7a   :  { %1032 = vmatprep.mubr.bf16.mxu1 %v96_v41  ;;  %v2404_v38 = vld [vmem:[#allocation7 + $0x40] ss:$16 sps:$4 sm:$0xff]   ;;  %v2415_v41 = vld [vmem:[#allocation7 + $0x2c] ss:$16 sps:$4 sm:$0xff]  }
  0x7b   :  { %962 = vmatpush1.bf16.msra.mxu0 %v2284_v14  ;;  %v93_v14 = vpack.c.bf16 %v85_v12, %v85_v12  ;;  %v2466_v12 = vld [vmem:[#allocation7 + $0x104] ss:$16 sps:$4 sm:$0xff]  }
  0x7c   :  { %1003 = vmatpush1.bf16.msra.mxu1 %v2287_v15  ;;  %963 = vmatprep.subr.bf16.mxu0 %v2292_v16  ;;  %v95_v15 = vpack.c.bf16 %v87_v13, %v87_v13  ;;  %v2374_v16 = vld [vmem:[#allocation7 + $0xe0] ss:$16 sps:$4 sm:$0xff]   ;;  %v2469_v13 = vld [vmem:[#allocation7 + $0x10c] ss:$16 sps:$4 sm:$0xff]  }
  0x7d   :  { %1004 = vmatprep.subr.bf16.mxu1 %v2295_v17  ;;  %v2376_v17 = vld [vmem:[#allocation7 + $0xe4] ss:$16 sps:$4 sm:$0xff]  }
  0x7f   :  { %964 = vmatpush1.bf16.msra.mxu0 %v2290_v18  ;;  %v2377_v18 = vld [vmem:[#allocation7 + $0xe8] ss:$16 sps:$4 sm:$0xff]  }
  0x80   :  { %1005 = vmatpush1.bf16.msra.mxu1 %v2293_v19  ;;  %965 = vmatprep.subr.bf16.mxu0 %v2298_v20  ;;  %v2379_v19 = vld [vmem:[#allocation7 + $0xec] ss:$16 sps:$4 sm:$0xff]   ;;  %v2382_v20 = vld [vmem:[#allocation7 + $0xc4] ss:$16 sps:$4 sm:$0xff]  }
  0x81   :  { %1006 = vmatprep.subr.bf16.mxu1 %v2301_v21  ;;  %v2385_v21 = vld [vmem:[#allocation7 + $0xcc] ss:$16 sps:$4 sm:$0xff]  }
  0x83   :  { %966 = vmatpush1.bf16.msra.mxu0 %v2296_v22  ;;  %v2380_v22 = vld [vmem:[#allocation7 + $0xc0] ss:$16 sps:$4 sm:$0xff]  }
  0x84   :  { %1007 = vmatpush1.bf16.msra.mxu1 %v2299_v23  ;;  %967 = vmatprep.subr.bf16.mxu0 %v2304_v24  ;;  %v2383_v23 = vld [vmem:[#allocation7 + $0xc8] ss:$16 sps:$4 sm:$0xff]   ;;  %v2388_v24 = vld [vmem:[#allocation7 + $0xa4] ss:$16 sps:$4 sm:$0xff]  }
  0x85   :  { %1008 = vmatprep.subr.bf16.mxu1 %v2307_v25  ;;  %v2391_v25 = vld [vmem:[#allocation7 + $0xac] ss:$16 sps:$4 sm:$0xff]  }
  0x87   :  { %968 = vmatpush1.bf16.msra.mxu0 %v2302_v26  ;;  %v2386_v26 = vld [vmem:[#allocation7 + $0xa0] ss:$16 sps:$4 sm:$0xff]  }
  0x88   :  { %1009 = vmatpush1.bf16.msra.mxu1 %v2305_v27  ;;  %969 = vmatprep.subr.bf16.mxu0 %v2310_v28  ;;  %v2389_v27 = vld [vmem:[#allocation7 + $0xa8] ss:$16 sps:$4 sm:$0xff]   ;;  %v2394_v28 = vld [vmem:[#allocation7 + $0x84] ss:$16 sps:$4 sm:$0xff]  }
  0x89   :  { %1010 = vmatprep.subr.bf16.mxu1 %v2313_v29  ;;  %v2397_v29 = vld [vmem:[#allocation7 + $0x8c] ss:$16 sps:$4 sm:$0xff]  }
  0x8b   :  { %970 = vmatpush1.bf16.msra.mxu0 %v2308_v30  ;;  %v2392_v30 = vld [vmem:[#allocation7 + $0x80] ss:$16 sps:$4 sm:$0xff]  }
  0x8c   :  { %1011 = vmatpush1.bf16.msra.mxu1 %v2311_v31  ;;  %971 = vmatprep.subr.bf16.mxu0 %v2316_v32  ;;  %v2395_v31 = vld [vmem:[#allocation7 + $0x88] ss:$16 sps:$4 sm:$0xff]   ;;  %v2400_v32 = vld [vmem:[#allocation7 + $0x64] ss:$16 sps:$4 sm:$0xff]  }
  0x8d   :  { %1012 = vmatprep.subr.bf16.mxu1 %v2319_v33  ;;  %v2403_v33 = vld [vmem:[#allocation7 + $0x6c] ss:$16 sps:$4 sm:$0xff]  }
  0x8f   :  { %972 = vmatpush1.bf16.msra.mxu0 %v2314_v34  ;;  %v2398_v34 = vld [vmem:[#allocation7 + $0x60] ss:$16 sps:$4 sm:$0xff]  }
  0x90   :  { %1013 = vmatpush1.bf16.msra.mxu1 %v2317_v36  ;;  %973 = vmatprep.subr.bf16.mxu0 %v2322_v37  ;;  %v2406_v36 = vld [vmem:[#allocation7 + $0x44] ss:$16 sps:$4 sm:$0xff]   ;;  %v2409_v37 = vld [vmem:[#allocation7 + $0x4c] ss:$16 sps:$4 sm:$0xff]  }
  0x91   :  { %1014 = vmatprep.subr.bf16.mxu1 %v2325_v40  ;;  %v2412_v40 = vld [vmem:[#allocation7 + $0x24] ss:$16 sps:$4 sm:$0xff]  }
  0x93   :  { %974 = vmatpush1.bf16.msra.mxu0 %v2320_v42  ;;  %v2410_v42 = vld [vmem:[#allocation7 + $0x20] ss:$16 sps:$4 sm:$0xff]  }
  0x94   :  { %1015 = vmatpush1.bf16.msra.mxu1 %v2323_v43  ;;  %975 = vmatprep.subr.bf16.mxu0 %v2328_v44  ;;  %v2413_v43 = vld [vmem:[#allocation7 + $0x28] ss:$16 sps:$4 sm:$0xff]   ;;  %v2418_v44 = vld [vmem:[#allocation7 + $0x4] ss:$16 sps:$4 sm:$0xff]  }
  0x95   :  { %1016 = vmatprep.subr.bf16.mxu1 %v2331_v45  ;;  %v2421_v45 = vld [vmem:[#allocation7 + $0xc] ss:$16 sps:$4 sm:$0xff]  }
  0x97   :  { %976 = vmatpush2.bf16.msra.mxu0 %v2326_v46  ;;  %v2416_v46 = vld [vmem:[#allocation7] ss:$16 sps:$4 sm:$0xff]  }
  0x98   :  { %1017 = vmatpush2.bf16.msra.mxu1 %v2329_v47  ;;  %977 = vmatprep.subr.bf16.mxu0 %v2334_v48  ;;  %v2419_v47 = vld [vmem:[#allocation7 + $0x8] ss:$16 sps:$4 sm:$0xff]   ;;  %v2424_v48 = vld [vmem:[#allocation7 + $0x1e4] ss:$16 sps:$4 sm:$0xff]  }
  0x99   :  { %1018 = vmatprep.subr.bf16.mxu1 %v2337_v49  ;;  %v2427_v49 = vld [vmem:[#allocation7 + $0x1ec] ss:$16 sps:$4 sm:$0xff]  }
  0x9b   :  { %978 = vmatpush2.bf16.msra.mxu0 %v2332_v50  ;;  %v2422_v50 = vld [vmem:[#allocation7 + $0x1e0] ss:$16 sps:$4 sm:$0xff]  }
  0x9c   :  { %1019 = vmatpush2.bf16.msra.mxu1 %v2335_v51  ;;  %979 = vmatprep.subr.bf16.mxu0 %v2340_v52  ;;  %v2425_v51 = vld [vmem:[#allocation7 + $0x1e8] ss:$16 sps:$4 sm:$0xff]   ;;  %v2430_v52 = vld [vmem:[#allocation7 + $0x1c4] ss:$16 sps:$4 sm:$0xff]  }
  0x9d   :  { %1020 = vmatprep.subr.bf16.mxu1 %v2343_v53  ;;  %v2433_v53 = vld [vmem:[#allocation7 + $0x1cc] ss:$16 sps:$4 sm:$0xff]  }
  0x9f   :  { %980 = vmatpush2.bf16.msra.mxu0 %v2338_v54  ;;  %v2428_v54 = vld [vmem:[#allocation7 + $0x1c0] ss:$16 sps:$4 sm:$0xff]  }
  0xa0   :  { %1021 = vmatpush2.bf16.msra.mxu1 %v2341_v55  ;;  %981 = vmatprep.subr.bf16.mxu0 %v2346_v56  ;;  %v2431_v55 = vld [vmem:[#allocation7 + $0x1c8] ss:$16 sps:$4 sm:$0xff]   ;;  %v2436_v56 = vld [vmem:[#allocation7 + $0x1a4] ss:$16 sps:$4 sm:$0xff]  }
  0xa1   :  { %1022 = vmatprep.subr.bf16.mxu1 %v2349_v57  ;;  %v2439_v57 = vld [vmem:[#allocation7 + $0x1ac] ss:$16 sps:$4 sm:$0xff]  }
  0xa3   :  { %982 = vmatpush2.bf16.msra.mxu0 %v2344_v58  ;;  %v2434_v58 = vld [vmem:[#allocation7 + $0x1a0] ss:$16 sps:$4 sm:$0xff]  }
  0xa4   :  { %1023 = vmatpush2.bf16.msra.mxu1 %v2347_v59  ;;  %983 = vmatprep.subr.bf16.mxu0 %v2352_v60  ;;  %v2437_v59 = vld [vmem:[#allocation7 + $0x1a8] ss:$16 sps:$4 sm:$0xff]   ;;  %v2442_v60 = vld [vmem:[#allocation7 + $0x184] ss:$16 sps:$4 sm:$0xff]  }
  0xa5   :  { %1024 = vmatprep.subr.bf16.mxu1 %v2355_v61  ;;  %v2445_v61 = vld [vmem:[#allocation7 + $0x18c] ss:$16 sps:$4 sm:$0xff]  }
  0xa7   :  { %984 = vmatpush2.bf16.msra.mxu0 %v2350_v62  ;;  %v2440_v62 = vld [vmem:[#allocation7 + $0x180] ss:$16 sps:$4 sm:$0xff]  }
  0xa8   :  { %1025 = vmatpush2.bf16.msra.mxu1 %v2353_v63  ;;  %985 = vmatprep.subr.bf16.mxu0 %v2358_v0  ;;  %v2443_v63 = vld [vmem:[#allocation7 + $0x188] ss:$16 sps:$4 sm:$0xff]   ;;  %v2448_v0 = vld [vmem:[#allocation7 + $0x164] ss:$16 sps:$4 sm:$0xff]  }
  0xa9   :  { %1026 = vmatprep.subr.bf16.mxu1 %v2361_v1  ;;  %v2451_v1 = vld [vmem:[#allocation7 + $0x16c] ss:$16 sps:$4 sm:$0xff]  }
  0xab   :  { %986 = vmatpush2.bf16.msra.mxu0 %v2356_v2  ;;  %v2446_v2 = vld [vmem:[#allocation7 + $0x160] ss:$16 sps:$4 sm:$0xff]  }
  0xac   :  { %1027 = vmatpush2.bf16.msra.mxu1 %v2359_v3  ;;  %987 = vmatprep.subr.bf16.mxu0 %v2364_v4  ;;  %v2449_v3 = vld [vmem:[#allocation7 + $0x168] ss:$16 sps:$4 sm:$0xff]   ;;  %v2454_v4 = vld [vmem:[#allocation7 + $0x144] ss:$16 sps:$4 sm:$0xff]  }
  0xad   :  { %1028 = vmatprep.subr.bf16.mxu1 %v2367_v5  ;;  %v2457_v5 = vld [vmem:[#allocation7 + $0x14c] ss:$16 sps:$4 sm:$0xff]  }
  0xaf   :  { %988 = vmatpush2.bf16.msra.mxu0 %v2362_v6  ;;  %v2452_v6 = vld [vmem:[#allocation7 + $0x140] ss:$16 sps:$4 sm:$0xff]  }
  0xb0   :  { %1029 = vmatpush2.bf16.msra.mxu1 %v2365_v7  ;;  %989 = vmatprep.subr.bf16.mxu0 %v2370_v8  ;;  %v2455_v7 = vld [vmem:[#allocation7 + $0x148] ss:$16 sps:$4 sm:$0xff]   ;;  %v2460_v8 = vld [vmem:[#allocation7 + $0x124] ss:$16 sps:$4 sm:$0xff]  }
  0xb1   :  { %1030 = vmatprep.subr.bf16.mxu1 %v2373_v9  ;;  %v2463_v9 = vld [vmem:[#allocation7 + $0x12c] ss:$16 sps:$4 sm:$0xff]  }
  0xb3   :  { %990 = vmatpush2.bf16.msra.mxu0 %v2368_v10  ;;  %v2458_v10 = vld [vmem:[#allocation7 + $0x120] ss:$16 sps:$4 sm:$0xff]  }
  0xb4   :  { %1031 = vmatpush2.bf16.msra.mxu1 %v2371_v11  ;;  %1451 = vmatprep.subr.bf16.mxu0 %v2376_v17  ;;  %v2461_v11 = vld [vmem:[#allocation7 + $0x128] ss:$16 sps:$4 sm:$0xff]  }
  0xb5   :  { %1492 = vmatprep.subr.bf16.mxu1 %v2379_v19  ;;  %v2471_v17 = vld [vmem:[#allocation8 + $0xf8] sm:$0xff]  }
  0xb6   :  { %992 = vmatmul.mubr.bf16.vlgmr.msra.gmra.mxu0 %v93_v14  ;;  %v2464_v14 = vld [vmem:[#allocation7 + $0x100] ss:$16 sps:$4 sm:$0xff]  }
  0xb7   :  { %1033 = vmatmul.mubr.bf16.vlgmr.msra.gmra.mxu1 %v95_v15  ;;  %1452 = vmatpush1.bf16.msra.mxu0 %v2374_v16  ;;  %v2467_v15 = vld [vmem:[#allocation7 + $0x108] ss:$16 sps:$4 sm:$0xff]  }
  0xb8   :  { %1493 = vmatpush1.bf16.msra.mxu1 %v2377_v18  ;;  %1453 = vmatprep.subr.bf16.mxu0 %v2382_v20  ;;  %v2470_v16 = vld [vmem:[#allocation8 + $0x78] sm:$0xff]  }
  0xb9   :  { %1494 = vmatprep.subr.bf16.mxu1 %v2385_v21 }
  0xbb   :  { %1454 = vmatpush1.bf16.msra.mxu0 %v2380_v22 }
  0xbc   :  { %1495 = vmatpush1.bf16.msra.mxu1 %v2383_v23  ;;  %1455 = vmatprep.subr.bf16.mxu0 %v2388_v24 }
  0xbd   :  { %1496 = vmatprep.subr.bf16.mxu1 %v2391_v25 }
  0xbf   :  { %1456 = vmatpush1.bf16.msra.mxu0 %v2386_v26  ;;  %v227_v26 = vlaneseq }
  0xc0   :  { %1497 = vmatpush1.bf16.msra.mxu1 %v2389_v27  ;;  %1457 = vmatprep.subr.bf16.mxu0 %v2394_v28 }
  0xc1   :  { %1498 = vmatprep.subr.bf16.mxu1 %v2397_v29  ;;  %v2673_v27 = vshrl.u32 %v227_v26, 7  ;;  %v225_v29 = vld [vmem:[%s2701_s2] sm:$0x3] }
  0xc3   :  { %1458 = vmatpush1.bf16.msra.mxu0 %v2392_v30  ;;  %v229_v28 = vsub.s32 0, %v2673_v27  ;;  %v233_v30 = vsub.s32 1, %v2673_v27 }
  0xc4   :  { %1499 = vmatpush1.bf16.msra.mxu1 %v2395_v31  ;;  %1459 = vmatprep.subr.bf16.mxu0 %v2400_v32 }
  0xc5   :  { %1500 = vmatprep.subr.bf16.mxu1 %v2403_v33  ;;  %v230_v31 = vrot.slane %v225_v29, %v229_v28  ;;  %v234_v32 = vrot.slane %v225_v29, %v233_v30 }
  0xc7   :  { %1460 = vmatpush1.bf16.msra.mxu0 %v2398_v34 }
  0xc8   :  { %1501 = vmatpush1.bf16.msra.mxu1 %v2401_v35  ;;  %1461 = vmatprep.subr.bf16.mxu0 %v2406_v36 }
  0xc9   :  { %1502 = vmatprep.subr.bf16.mxu1 %v2409_v37 }
  0xcb   :  { %1462 = vmatpush1.bf16.msra.mxu0 %v2404_v38 }
  0xcc   :  { %1503 = vmatpush1.bf16.msra.mxu1 %v2407_v39  ;;  %1463 = vmatprep.subr.bf16.mxu0 %v2412_v40 }
  0xcd   :  { %1504 = vmatprep.subr.bf16.mxu1 %v2415_v41 }
  0xcf   :  { %1464 = vmatpush1.bf16.msra.mxu0 %v2410_v42 }
  0xd0   :  { %1505 = vmatpush1.bf16.msra.mxu1 %v2413_v43  ;;  %1465 = vmatprep.subr.bf16.mxu0 %v2418_v44 }
  0xd1   :  { %1506 = vmatprep.subr.bf16.mxu1 %v2421_v45 }
  0xd3   :  { %1466 = vmatpush1.bf16.msra.mxu0 %v2416_v46 }
  0xd4   :  { %1507 = vmatpush1.bf16.msra.mxu1 %v2419_v47  ;;  %1467 = vmatprep.subr.bf16.mxu0 %v2424_v48 }
  0xd5   :  { %1508 = vmatprep.subr.bf16.mxu1 %v2427_v49 }
  0xd7   :  { %1468 = vmatpush2.bf16.msra.mxu0 %v2422_v50 }
  0xd8   :  { %1509 = vmatpush2.bf16.msra.mxu1 %v2425_v51  ;;  %1469 = vmatprep.subr.bf16.mxu0 %v2430_v52  ;;  %v2472_v52 = vld [vmem:[#allocation8 + $0x38] sm:$0xff]  }
  0xd9   :  { %1510 = vmatprep.subr.bf16.mxu1 %v2433_v53  ;;  %v2473_v53 = vld [vmem:[#allocation8 + $0xb8] sm:$0xff]  }
  0xdb   :  { %1470 = vmatpush2.bf16.msra.mxu0 %v2428_v54 }
  0xdc   :  { %1511 = vmatpush2.bf16.msra.mxu1 %v2431_v55  ;;  %1471 = vmatprep.subr.bf16.mxu0 %v2436_v56  ;;  %v2474_v55 = vld [vmem:[#allocation8 + $0x70] sm:$0xff]  }
  0xdd   :  { %1512 = vmatprep.subr.bf16.mxu1 %v2439_v57  ;;  %v2475_v56 = vld [vmem:[#allocation8 + $0xf0] sm:$0xff]  }
  0xde   :  { %v2476_v57 = vld [vmem:[#allocation8 + $0x30] sm:$0xff]  }
  0xdf   :  { %1472 = vmatpush2.bf16.msra.mxu0 %v2434_v58  ;;  %v2477_v58 = vld [vmem:[#allocation8 + $0xb0] sm:$0xff]  }
  0xe0   :  { %1513 = vmatpush2.bf16.msra.mxu1 %v2437_v59  ;;  %1473 = vmatprep.subr.bf16.mxu0 %v2442_v60  ;;  %v2478_v59 = vld [vmem:[#allocation8 + $0x68] sm:$0xff]  }
  0xe1   :  { %1514 = vmatprep.subr.bf16.mxu1 %v2445_v61  ;;  %v2479_v60 = vld [vmem:[#allocation8 + $0xe8] sm:$0xff]  }
  0xe2   :  { %v2480_v61 = vld [vmem:[#allocation8 + $0x28] sm:$0xff]  }
  0xe3   :  { %1474 = vmatpush2.bf16.msra.mxu0 %v2440_v62  ;;  %v2481_v62 = vld [vmem:[#allocation8 + $0xa8] sm:$0xff]  }
  0xe4   :  { %1515 = vmatpush2.bf16.msra.mxu1 %v2443_v63  ;;  %1475 = vmatprep.subr.bf16.mxu0 %v2448_v0  ;;  %v2482_v63 = vld [vmem:[#allocation8 + $0x60] sm:$0xff]  }
  0xe5   :  { %1516 = vmatprep.subr.bf16.mxu1 %v2451_v1  ;;  %v2483_v0 = vld [vmem:[#allocation8 + $0xe0] sm:$0xff]  }
  0xe6   :  { %v2484_v1 = vld [vmem:[#allocation8 + $0x20] sm:$0xff]  }
  0xe7   :  { %1476 = vmatpush2.bf16.msra.mxu0 %v2446_v2  ;;  %v2485_v2 = vld [vmem:[#allocation8 + $0xa0] sm:$0xff]  }
  0xe8   :  { %1517 = vmatpush2.bf16.msra.mxu1 %v2449_v3  ;;  %1477 = vmatprep.subr.bf16.mxu0 %v2454_v4  ;;  %v2486_v3 = vld [vmem:[#allocation8 + $0x58] sm:$0xff]  }
  0xe9   :  { %1518 = vmatprep.subr.bf16.mxu1 %v2457_v5  ;;  %v2487_v4 = vld [vmem:[#allocation8 + $0xd8] sm:$0xff]  }
  0xea   :  { %v2488_v5 = vld [vmem:[#allocation8 + $0x18] sm:$0xff]  }
  0xeb   :  { %1478 = vmatpush2.bf16.msra.mxu0 %v2452_v6  ;;  %v2489_v6 = vld [vmem:[#allocation8 + $0x98] sm:$0xff]  }
  0xec   :  { %1519 = vmatpush2.bf16.msra.mxu1 %v2455_v7  ;;  %1479 = vmatprep.subr.bf16.mxu0 %v2460_v8  ;;  %v2490_v7 = vld [vmem:[#allocation8 + $0x50] sm:$0xff]  }
  0xed   :  { %1520 = vmatprep.subr.bf16.mxu1 %v2463_v9  ;;  %v2491_v8 = vld [vmem:[#allocation8 + $0xd0] sm:$0xff]  }
  0xee   :  { %v2492_v9 = vld [vmem:[#allocation8 + $0x10] sm:$0xff]  }
  0xef   :  { %1480 = vmatpush2.bf16.msra.mxu0 %v2458_v10  ;;  %v2493_v10 = vld [vmem:[#allocation8 + $0x90] sm:$0xff]  }
  0xf0   :  { %1521 = vmatpush2.bf16.msra.mxu1 %v2461_v11  ;;  %1481 = vmatprep.subr.bf16.mxu0 %v2466_v12  ;;  %v2494_v11 = vld [vmem:[#allocation8 + $0x48] sm:$0xff]  }
  0xf1   :  { %1522 = vmatprep.subr.bf16.mxu1 %v2469_v13  ;;  %v2495_v12 = vld [vmem:[#allocation8 + $0xc8] sm:$0xff]  }
  0xf2   :  { %v2496_v13 = vld [vmem:[#allocation8 + $0x8] sm:$0xff]  }
  0xf3   :  { %1482 = vmatpush2.bf16.msra.mxu0 %v2464_v14  ;;  %v2497_v14 = vld [vmem:[#allocation8 + $0x88] sm:$0xff]  }
  0xf4   :  { %1523 = vmatpush2.bf16.msra.mxu1 %v2467_v15  ;;  %2127 = vmatprep.subr.bf16.mxu0 %v2470_v16  ;;  %v2498_v15 = vld [vmem:[#allocation8 + $0x40] sm:$0xff]  }
  0xf5   :  { %2149 = vmatprep.subr.bf16.mxu1 %v2471_v17  ;;  %v2499_v16 = vld [vmem:[#allocation8 + $0xc0] sm:$0xff]  }
  0xf6   :  { %v2500_v17 = vld [vmem:[#allocation8] sm:$0xff]  }
 0x136   :  { %v911_v18 = vpop.f32.mrf.mxu0 }
 0x137   :  { %v952_v19 = vpop.f32.mrf.mxu1  ;;  %v912_v33 = vadd.f32 %v911_v18, %v230_v31  ;;  %v2501_v18 = vld [vmem:[#allocation8 + $0x80] sm:$0xff]  }
 0x138   :  { %v913_v20 = vpop.f32.mrf.mxu0 }
 0x139   :  { %v954_v21 = vpop.f32.mrf.mxu1  ;;  %v914_v34 = vadd.f32 %v913_v20, %v234_v32  ;;  %v953_v35 = vadd.f32 %v952_v19, %v912_v33  ;;  %v1121_v19 = vsub.s32 2, %v2673_v27  ;;  %v1109_v20 = vld [vmem:[%s2703_s4] sm:$0xf] }
 0x13a   :  { %v915_v22 = vpop.f32.mrf.mxu0 }
 0x13b   :  { %v956_v23 = vpop.f32.mrf.mxu1  ;;  %v955_v38 = vadd.f32 %v954_v21, %v914_v34  ;;  %v1125_v21 = vsub.s32 3, %v2673_v27  ;;  %v1114_v22 = vrot.slane %v1109_v20, %v229_v28 }
 0x13c   :  { %v916_v24 = vpop.f32.mrf.mxu0  ;;  %v1122_v23 = vrot.slane %v1109_v20, %v1121_v19 }
 0x13d   :  { %v957_v25 = vpop.f32.mrf.mxu1  ;;  %v1118_v24 = vrot.slane %v1109_v20, %v233_v30 }
 0x13e   :  { %v1126_v25 = vrot.slane %v1109_v20, %v1125_v21 }
 0x176   :  { %v993_v36 = vpop.f32.mrf.mxu0 }
 0x177   :  { %v1034_v37 = vpop.f32.mrf.mxu1  ;;  %v994_v39 = vadd.f32 %v993_v36, %v953_v35 }
 0x178   :  { %v995_v40 = vpop.f32.mrf.mxu0 }
 0x179   :  { %v1036_v41 = vpop.f32.mrf.mxu1  ;;  %v1035_v42 = vadd.f32 %v1034_v37, %v994_v39  ;;  %v996_v43 = vadd.f32 %v995_v40, %v955_v38 }
 0x17a   :  { %v997_v44 = vpop.f32.mrf.mxu0 }
 0x17b   :  { %v1038_v45 = vpop.f32.mrf.mxu1  ;;  %v1037_v46 = vadd.f32 %v1036_v41, %v996_v43  ;;  %v1041_v47 = vmax.f32 %v1035_v42, 0.0 }
 0x17c   :  { %v998_v48 = vpop.f32.mrf.mxu0 }
 0x17d   :  { %v1039_v49 = vpop.f32.mrf.mxu1  ;;  %v1042_v50 = vmax.f32 %v1037_v46, 0.0  ;;  %v1043_v54 = vpack.c.bf16 %v1041_v47, %v1041_v47  ;;  %v2094_v48 = vld [vmem:[%s2705_s6] ss:$0 sm:$0xff] }
 0x17f   :  { %v1044_v51 = vpack.c.bf16 %v1042_v50, %v1042_v50 }
 0x181   :  { %1483 = vmatprep.mubr.bf16.mxu0 %v1044_v51  ;;  %1524 = vmatprep.mubr.bf16.mxu1 %v1044_v51 }
 0x182   :  { %1484 = vmatmul.mubr.bf16.vlgmr.msra.gmra.mxu0 %v1043_v54  ;;  %1525 = vmatmul.mubr.bf16.vlgmr.msra.gmra.mxu1 %v1043_v54 }
 0x183   :  { %2128 = vmatpush3.bf16.msra.mxu0 %v2472_v52  ;;  %2150 = vmatpush3.bf16.msra.mxu1 %v2473_v53 }
 0x184   :  { %2129 = vmatprep.subr.bf16.mxu0 %v2474_v55  ;;  %2151 = vmatprep.subr.bf16.mxu1 %v2475_v56 }
 0x187   :  { %2130 = vmatpush3.bf16.msra.mxu0 %v2476_v57  ;;  %2152 = vmatpush3.bf16.msra.mxu1 %v2477_v58 }
 0x188   :  { %2131 = vmatprep.subr.bf16.mxu0 %v2478_v59  ;;  %2153 = vmatprep.subr.bf16.mxu1 %v2479_v60 }
 0x18b   :  { %2132 = vmatpush3.bf16.msra.mxu0 %v2480_v61  ;;  %2154 = vmatpush3.bf16.msra.mxu1 %v2481_v62 }
 0x18c   :  { %2133 = vmatprep.subr.bf16.mxu0 %v2482_v63  ;;  %2155 = vmatprep.subr.bf16.mxu1 %v2483_v0 }
 0x18f   :  { %2134 = vmatpush3.bf16.msra.mxu0 %v2484_v1  ;;  %2156 = vmatpush3.bf16.msra.mxu1 %v2485_v2 }
 0x190   :  { %2135 = vmatprep.subr.bf16.mxu0 %v2486_v3  ;;  %2157 = vmatprep.subr.bf16.mxu1 %v2487_v4 }
 0x193   :  { %2136 = vmatpush3.bf16.msra.mxu0 %v2488_v5  ;;  %2158 = vmatpush3.bf16.msra.mxu1 %v2489_v6 }
 0x194   :  { %2137 = vmatprep.subr.bf16.mxu0 %v2490_v7  ;;  %2159 = vmatprep.subr.bf16.mxu1 %v2491_v8 }
 0x197   :  { %2138 = vmatpush3.bf16.msra.mxu0 %v2492_v9  ;;  %2160 = vmatpush3.bf16.msra.mxu1 %v2493_v10 }
 0x198   :  { %2139 = vmatprep.subr.bf16.mxu0 %v2494_v11  ;;  %2161 = vmatprep.subr.bf16.mxu1 %v2495_v12 }
 0x19b   :  { %2140 = vmatpush3.bf16.msra.mxu0 %v2496_v13  ;;  %2162 = vmatpush3.bf16.msra.mxu1 %v2497_v14 }
 0x19c   :  { %2141 = vmatprep.subr.bf16.mxu0 %v2498_v15  ;;  %2163 = vmatprep.subr.bf16.mxu1 %v2499_v16 }
 0x19f   :  { %2142 = vmatpush3.bf16.msra.mxu0 %v2500_v17  ;;  %2164 = vmatpush3.bf16.msra.mxu1 %v2501_v18 }
 0x242   :  { %v1485_v26 = vpop.f32.mrf.mxu0  ;;  %v1526_v29 = vpop.f32.mrf.mxu1 }
 0x243   :  { %v1486_v31 = vadd.f32 %v1485_v26, %v1114_v22  ;;  %v1527_v32 = vadd.f32 %v1526_v29, %v1122_v23 }
 0x244   :  { %v1487_v33 = vpop.f32.mrf.mxu0  ;;  %v1528_v34 = vpop.f32.mrf.mxu1 }
 0x245   :  { %v1488_v35 = vadd.f32 %v1487_v33, %v1118_v24  ;;  %v1529_v36 = vadd.f32 %v1528_v34, %v1126_v25  ;;  %v1533_v37 = vmax.f32 %v1486_v31, 0.0  ;;  %v1535_v38 = vmax.f32 %v1527_v32, 0.0 }
 0x246   :  { %v1489_v39 = vpop.f32.mrf.mxu0  ;;  %v1530_v40 = vpop.f32.mrf.mxu1 }
 0x247   :  { %v1534_v41 = vmax.f32 %v1488_v35, 0.0  ;;  %v1536_v42 = vmax.f32 %v1529_v36, 0.0  ;;  %v1537_v30 = vpack.c.bf16 %v1533_v37, %v1533_v37  ;;  %v1539_v45 = vpack.c.bf16 %v1535_v38, %v1535_v38 }
 0x248   :  { %v1490_v28 = vpop.f32.mrf.mxu0  ;;  %v1531_v43 = vpop.f32.mrf.mxu1 }
 0x249   :  { %v1538_v44 = vpack.c.bf16 %v1534_v41, %v1534_v41  ;;  %v1540_v27 = vpack.c.bf16 %v1536_v42, %v1536_v42 }
 0x24b   :  { %1836 = vmatprep.mubr.bf16.mxu0 %v1538_v44  ;;  %1876 = vmatprep.mubr.bf16.mxu1 %v1540_v27 }
 0x24c   :  { %1837 = vmatmul.mubr.bf16.vlgmr.msra.gmra.mxu0 %v1537_v30  ;;  %1877 = vmatmul.mubr.bf16.vlgmr.msra.gmra.mxu1 %v1539_v45 }
 0x30c   :  { %v2143_v46 = vpop.f32.mrf.mxu0  ;;  %v2165_v47 = vpop.f32.mrf.mxu1 }
 0x30e   :  { %v2144_v49 = vpop.f32.mrf.mxu0  ;;  %v2166_v50 = vpop.f32.mrf.mxu1 }
 0x30f   :  { %v2145_v51 = vadd.f32 %v2144_v49, %v2143_v46  ;;  %v2167_v55 = vadd.f32 %v2166_v50, %v2165_v47 }
 0x310   :  { %v2146_v52 = vpop.f32.mrf.mxu0  ;;  %v2168_v53 = vpop.f32.mrf.mxu1 }
 0x311   :  { %v1839_v54 = vadd.f32 %v2145_v51, %v2094_v48 }
 0x312   :  { %v2147_v56 = vpop.f32.mrf.mxu0  ;;  %v2169_v57 = vpop.f32.mrf.mxu1 }
 0x313   :  { %v1879_v58 = vadd.f32 %v2167_v55, %v1839_v54 }
 0x315   :  { %1884 = vst [vmem:[#allocation10] sm:$0xff] %v1879_v58 }
 0x316   :  { %2593 = shalt.err (!%p2590_p10)
}
 0x317   :  { %1894 = dma.vmem_to_hbm [thread:$0]  %s1892_s28, 128, %s2706_s7, [#allocation4]  }
 0x318   :  { %2608 = dma.done.wait [#allocation4], 128  }
 0x319   :  { %2609 = vsyncadd [#allocation4], 4294967168 }
 0x31a   :  { %1898 = vsyncpa [#allocation3], 1 }
 0x31b   :  { %1899 = vsyncpa [#allocation6], 1 }
 0x31c   :  { %1900 = vsyncpa [#allocation9], 1 }
 0x31d   :  { %1901 = vsyncpa [#allocation4], 1 }

</bundles_post_ra>
